<compile_context>
chip_gen: v7x
topology: tpu7x:2x2x1
jax: 0.10.0
libtpu: 0.0.40
codegen_flags: <defaults>
</compile_context>

<pallas_src>
import jax
import jax.numpy as jnp
from jax.experimental import pallas as pl
from jax.experimental.pallas import tpu as pltpu

# ---------------- configuration (mirrors AugProjector.__init__) ----------------
AUG_DESC_SIZE_CONFIG = {'crop': 4, 'color': 4, 'flip': 1, 'blur': 1,
                        'grayscale': 1, 'color_diff': 3}
AUG_COND = ['crop', 'color']
NUM_AUG = sum(AUG_DESC_SIZE_CONFIG[k] for k in AUG_COND)   # 8
D_BACKBONE = 32      # args.num_backbone_features
AUG_NN_WIDTH = 32    # args.aug_nn_width (aug_processor hidden & out for proj-cat)
PROJ_HIDDEN = D_BACKBONE
PROJ_OUT = 32        # proj_out_dim
BATCH = 8
BN_EPS = 1e-5

# Pack 4 batch rows per 128-lane row (all feature widths are 32 -> 4*32 = 128).
PACK = 4
assert PACK * D_BACKBONE == 128 and PACK * AUG_NN_WIDTH == 128
assert PACK * PROJ_HIDDEN == 128 and PACK * PROJ_OUT == 128

# Row layout of the single packed constant slab (all blocks are 128 cols wide).
R_AW1 = PACK * NUM_AUG        # 32
R_PW1X = PACK * D_BACKBONE    # 128
R_AW2P = PACK * AUG_NN_WIDTH  # 128
R_PW2 = PACK * PROJ_HIDDEN    # 128
OFF_AW1 = 0
OFF_PW1X = OFF_AW1 + R_AW1
OFF_AW2P = OFF_PW1X + R_PW1X
OFF_PW2 = OFF_AW2P + R_AW2P
OFF_VEC = OFF_PW2 + R_PW2     # 416: [ashift; pshift_combined; pb2] rows
SLAB_ROWS = OFF_VEC + 8       # 424 (vector rows padded to a multiple of 8)


# ------------------------------- Pallas kernel ---------------------------------
def aug_projector_kernel(x_ref, a_ref, w_ref, o_ref):
    # x_ref: (TM, 128)  = 4 packed backbone rows     (lane-dense)
    # a_ref: (TM, 32)   = 4 packed aug-descriptor rows
    # w_ref: (424, 128) = [kron(I4,aw1f); kron(I4,pw1xf); kron(I4,aw2p);
    #                      kron(I4,pw2); ashift; pshift_combined; pb2; 0-pad]
    x = x_ref[...]
    a = a_ref[...]

    aw1 = w_ref[OFF_AW1:OFF_AW1 + R_AW1, :]
    pw1x = w_ref[OFF_PW1X:OFF_PW1X + R_PW1X, :]
    aw2p = w_ref[OFF_AW2P:OFF_AW2P + R_AW2P, :]
    pw2 = w_ref[OFF_PW2:OFF_PW2 + R_PW2, :]
    ashift = w_ref[OFF_VEC + 0:OFF_VEC + 1, :]
    pshift = w_ref[OFF_VEC + 1:OFF_VEC + 2, :]
    pbias = w_ref[OFF_VEC + 2:OFF_VEC + 3, :]

    # aug_processor layer 1 (BN scale pre-folded into aw1): ReLU(aug @ aw1f + ashift)
    h = jnp.maximum(
        jnp.dot(a, aw1, preferred_element_type=jnp.float32) + ashift, 0.0)

    # proj-cat + projector layer 1 (aw2/ab2/pw1a folded into aw2p & pshift):
    #   ReLU(x @ pw1xf + h @ aw2p + pshift_combined)
    g = jnp.maximum(
        jnp.dot(x, pw1x, preferred_element_type=jnp.float32)
        + jnp.dot(h, aw2p, preferred_element_type=jnp.float32)
        + pshift, 0.0)

    # projector layer 2 (last_bn=False)
    o_ref[...] = (jnp.dot(g, pw2, preferred_element_type=jnp.float32)
                  + pbias).astype(o_ref.dtype)


def _round_up(n, m):
    return ((n + m - 1) // m) * m


@jax.jit
def aug_projector_forward(x, aug_desc, kp):
    B = x.shape[0]
    bp = -(-B // PACK)                       # packed rows needed
    tm = min(512, _round_up(max(bp, 1), 8))  # packed-row tile (multiple of 8)
    bp_pad = _round_up(bp, tm)
    b_pad = bp_pad * PACK

    # Zero-pad batch, then fold 4 rows into one lane-dense 128-wide row.
    # These reshapes are contiguous row-major views on HBM (zero cost).
    x_p = jnp.zeros((b_pad, D_BACKBONE), jnp.float32).at[:B].set(
        x.astype(jnp.float32))
    a_p = jnp.zeros((b_pad, NUM_AUG), jnp.float32).at[:B].set(
        aug_desc.astype(jnp.float32))
    x4 = x_p.reshape(bp_pad, PACK * D_BACKBONE)
    a4 = a_p.reshape(bp_pad, PACK * NUM_AUG)

    out4 = pl.pallas_call(
        aug_projector_kernel,
        out_shape=jax.ShapeDtypeStruct((bp_pad, PACK * PROJ_OUT), jnp.float32),
        grid=(bp_pad // tm,),
        in_specs=[
            pl.BlockSpec((tm, PACK * D_BACKBONE), lambda i: (i, 0)),
            pl.BlockSpec((tm, PACK * NUM_AUG), lambda i: (i, 0)),
            # Constants: constant block index -> fetched once, stay
            # VMEM-resident across all batch tiles.
            pl.BlockSpec((SLAB_ROWS, 128), lambda i: (0, 0)),
        ],
        out_specs=pl.BlockSpec((tm, PACK * PROJ_OUT), lambda i: (i, 0)),
        compiler_params=pltpu.CompilerParams(
            dimension_semantics=("parallel",)),   # megacore split on v7x
    )(x4, a4, kp['wslab'])

    return out4.reshape(b_pad, PROJ_OUT)[:B]


# ---------------------------- parameter construction ---------------------------
def init_raw_params(key):
    """Raw module parameters (PyTorch layout), with non-trivial eval BN stats."""
    ks = jax.random.split(key, 16)

    def lin(k, fan_in, fan_out):
        return jax.random.normal(k, (fan_in, fan_out), jnp.float32) * 0.05

    def vec(k, n):
        return jax.random.normal(k, (1, n), jnp.float32) * 0.05

    def bn_folded(kg, kb, km, kv, n):
        gamma = 1.0 + 0.1 * jax.random.normal(kg, (1, n), jnp.float32)
        beta = 0.1 * jax.random.normal(kb, (1, n), jnp.float32)
        mean = 0.1 * jax.random.normal(km, (1, n), jnp.float32)
        var = jnp.abs(jax.random.normal(kv, (1, n), jnp.float32)) + 0.5
        scale = gamma / jnp.sqrt(var + BN_EPS)
        shift = beta - mean * scale
        return scale, shift

    aw1 = lin(ks[0], NUM_AUG, AUG_NN_WIDTH)                   # Linear, bias=False (pre-BN)
    aw2 = lin(ks[1], AUG_NN_WIDTH, AUG_NN_WIDTH)
    ab2 = vec(ks[2], AUG_NN_WIDTH)
    pw1 = lin(ks[3], D_BACKBONE + AUG_NN_WIDTH, PROJ_HIDDEN)  # Linear, bias=False (pre-BN)
    pw2 = lin(ks[4], PROJ_HIDDEN, PROJ_OUT)
    pb2 = vec(ks[5], PROJ_OUT)
    ascale, ashift = bn_folded(ks[6], ks[7], ks[8], ks[9], AUG_NN_WIDTH)
    pscale, pshift = bn_folded(ks[10], ks[11], ks[12], ks[13], PROJ_HIDDEN)

    return dict(aw1=aw1, aw2=aw2, ab2=ab2, pw1=pw1, pw2=pw2, pb2=pb2,
                ascale=ascale, ashift=ashift, pscale=pscale, pshift=pshift)


def fold_params(p):
    """Offline algebra: BN fold + aug_feat elimination + block-diag lane packing."""
    aw1f = p['aw1'] * p['ascale']                     # fold aug BN scale
    pw1xf = p['pw1'][:D_BACKBONE] * p['pscale']       # fold proj BN scale (x part)
    pw1af = p['pw1'][D_BACKBONE:] * p['pscale']       # fold proj BN scale (aug part)
    aw2p = p['aw2'] @ pw1af                           # eliminate aug_feat matmul
    pshift_c = p['pshift'] + p['ab2'] @ pw1af         # fold ab2 contribution into shift

    eye = jnp.eye(PACK, dtype=jnp.float32)
    blk = lambda w: jnp.kron(eye, w)                  # block-diag -> 128-wide tiles
    vec_rows = jnp.concatenate(
        [jnp.tile(p['ashift'], (1, PACK)),
         jnp.tile(pshift_c, (1, PACK)),
         jnp.tile(p['pb2'], (1, PACK)),
         jnp.zeros((SLAB_ROWS - OFF_VEC - 3, 128), jnp.float32)], axis=0)
    wslab = jnp.concatenate(
        [blk(aw1f), blk(pw1xf), blk(aw2p), blk(p['pw2']), vec_rows],
        axis=0)                                       # (424, 128)
    return dict(wslab=wslab)


def reference_forward(x, aug_desc, p):
    # Pure-JAX mirror of the PyTorch forward (mlp treatment, proj-cat, eval BN).
    h = jnp.maximum((aug_desc @ p['aw1']) * p['ascale'] + p['ashift'], 0.0)
    aug_feat = h @ p['aw2'] + p['ab2']
    cat = jnp.concatenate([x, aug_feat], axis=1)
    g = jnp.maximum((cat @ p['pw1']) * p['pscale'] + p['pshift'], 0.0)
    return g @ p['pw2'] + p['pb2']


# ------------------------------------ main --------------------------------------
if __name__ == "__main__":
    key = jax.random.PRNGKey(0)
    k_x, k_a, k_p = jax.random.split(key, 3)

    x = jax.random.normal(k_x, (BATCH, D_BACKBONE), jnp.float32)
    aug_desc = jax.random.normal(k_a, (BATCH, NUM_AUG), jnp.float32)

    raw = init_raw_params(k_p)
    kp = fold_params(raw)

    out = aug_projector_forward(x, aug_desc, kp)
    out = jax.block_until_ready(out)

    ref = reference_forward(x, aug_desc, raw)
    assert out.shape == (BATCH, PROJ_OUT), out.shape
    assert jnp.allclose(out, ref, atol=1e-4, rtol=1e-4), \
        float(jnp.max(jnp.abs(out - ref)))

    print("KERNEL_OK")
</pallas_src>

<mosaic_0001>
module attributes {stable_mosaic.version = 11 : i64} {
  func.func @aug_projector_kernel(%arg0: i32, %arg1: memref<8x128xf32, #tpu.memory_space<vmem>>, %arg2: memref<8x32xf32, #tpu.memory_space<vmem>>, %arg3: memref<424x128xf32, #tpu.memory_space<vmem>>, %arg4: memref<8x128xf32, #tpu.memory_space<vmem>>) attributes {dimension_semantics = [#tpu.dimension_semantics<parallel>], iteration_bounds = array<i64: 1>, scalar_prefetch = 0 : i64, scratch_operands = 0 : i64, tpu.core_type = #tpu.core_type<tc>, window_params = [{transform_indices = @transform_0, window_bounds = array<i64: 8, 128>}, {transform_indices = @transform_1, window_bounds = array<i64: 8, 32>}, {pipeline_mode = #tpu.pipeline_mode<synchronous>, transform_indices = @transform_2, window_bounds = array<i64: 424, 128>}, {transform_indices = @transform_3, window_bounds = array<i64: 8, 128>}]} {
    %c0 = arith.constant 0 : index
    %c0_0 = arith.constant 0 : index
    %0 = vector.load %arg1[%c0, %c0_0] : memref<8x128xf32, #tpu.memory_space<vmem>>, vector<8x128xf32>
    %c0_1 = arith.constant 0 : index
    %c0_2 = arith.constant 0 : index
    %1 = vector.load %arg2[%c0_1, %c0_2] : memref<8x32xf32, #tpu.memory_space<vmem>>, vector<8x32xf32>
    %c0_3 = arith.constant 0 : index
    %c0_4 = arith.constant 0 : index
    %2 = vector.load %arg3[%c0_3, %c0_4] : memref<424x128xf32, #tpu.memory_space<vmem>>, vector<32x128xf32>
    %c32 = arith.constant 32 : index
    %c0_5 = arith.constant 0 : index
    %3 = vector.load %arg3[%c32, %c0_5] : memref<424x128xf32, #tpu.memory_space<vmem>>, vector<128x128xf32>
    %c160 = arith.constant 160 : index
    %c0_6 = arith.constant 0 : index
    %4 = vector.load %arg3[%c160, %c0_6] : memref<424x128xf32, #tpu.memory_space<vmem>>, vector<128x128xf32>
    %c288 = arith.constant 288 : index
    %c0_7 = arith.constant 0 : index
    %5 = vector.load %arg3[%c288, %c0_7] : memref<424x128xf32, #tpu.memory_space<vmem>>, vector<128x128xf32>
    %c416 = arith.constant 416 : index
    %c0_8 = arith.constant 0 : index
    %6 = vector.load %arg3[%c416, %c0_8] : memref<424x128xf32, #tpu.memory_space<vmem>>, vector<1x128xf32>
    %c417 = arith.constant 417 : index
    %c0_9 = arith.constant 0 : index
    %7 = vector.load %arg3[%c417, %c0_9] : memref<424x128xf32, #tpu.memory_space<vmem>>, vector<1x128xf32>
    %c418 = arith.constant 418 : index
    %c0_10 = arith.constant 0 : index
    %8 = vector.load %arg3[%c418, %c0_10] : memref<424x128xf32, #tpu.memory_space<vmem>>, vector<1x128xf32>
    %cst = arith.constant dense<0.000000e+00> : vector<8x128xf32>
    %9 = tpu.matmul %1, %2, %cst {dimension_numbers = #tpu.dot_dimension_numbers<[1], [0], [0], [1], [0, 0, 1, 1], [], []>} : vector<8x32xf32>, vector<32x128xf32>, vector<8x128xf32> -> vector<8x128xf32>
    %10 = vector.broadcast %6 : vector<1x128xf32> to vector<8x128xf32>
    %11 = arith.addf %9, %10 : vector<8x128xf32>
    %cst_11 = arith.constant 0.000000e+00 : f32
    %12 = vector.broadcast %cst_11 : f32 to vector<8x128xf32>
    %13 = arith.maximumf %11, %12 : vector<8x128xf32>
    %cst_12 = arith.constant dense<0.000000e+00> : vector<8x128xf32>
    %14 = tpu.matmul %0, %3, %cst_12 {dimension_numbers = #tpu.dot_dimension_numbers<[1], [0], [0], [1], [0, 0, 1, 1], [], []>} : vector<8x128xf32>, vector<128x128xf32>, vector<8x128xf32> -> vector<8x128xf32>
    %cst_13 = arith.constant dense<0.000000e+00> : vector<8x128xf32>
    %15 = tpu.matmul %13, %4, %cst_13 {dimension_numbers = #tpu.dot_dimension_numbers<[1], [0], [0], [1], [0, 0, 1, 1], [], []>} : vector<8x128xf32>, vector<128x128xf32>, vector<8x128xf32> -> vector<8x128xf32>
    %16 = arith.addf %14, %15 : vector<8x128xf32>
    %17 = vector.broadcast %7 : vector<1x128xf32> to vector<8x128xf32>
    %18 = arith.addf %16, %17 : vector<8x128xf32>
    %cst_14 = arith.constant 0.000000e+00 : f32
    %19 = vector.broadcast %cst_14 : f32 to vector<8x128xf32>
    %20 = arith.maximumf %18, %19 : vector<8x128xf32>
    %cst_15 = arith.constant dense<0.000000e+00> : vector<8x128xf32>
    %21 = tpu.matmul %20, %5, %cst_15 {dimension_numbers = #tpu.dot_dimension_numbers<[1], [0], [0], [1], [0, 0, 1, 1], [], []>} : vector<8x128xf32>, vector<128x128xf32>, vector<8x128xf32> -> vector<8x128xf32>
    %22 = vector.broadcast %8 : vector<1x128xf32> to vector<8x128xf32>
    %23 = arith.addf %21, %22 : vector<8x128xf32>
    %c0_16 = arith.constant 0 : index
    %c0_17 = arith.constant 0 : index
    %24 = vector.load %arg4[%c0_16, %c0_17] : memref<8x128xf32, #tpu.memory_space<vmem>>, vector<8x128xf32>
    tpu.vector_store %arg4[%c0_16, %c0_17], %23 {strides = array<i32>} : memref<8x128xf32, #tpu.memory_space<vmem>>, vector<8x128xf32>,
    return
  }
  func.func @transform_0(%arg0: i32) -> (i32, i32) {
    %c0_i32 = arith.constant 0 : i32
    %c0_i32_0 = arith.constant 0 : i32
    return %arg0, %c0_i32 : i32, i32
  }
  func.func @transform_1(%arg0: i32) -> (i32, i32) {
    %c0_i32 = arith.constant 0 : i32
    %c0_i32_0 = arith.constant 0 : i32
    return %arg0, %c0_i32 : i32, i32
  }
  func.func @transform_2(%arg0: i32) -> (i32, i32) {
    %c0_i32 = arith.constant 0 : i32
    %c0_i32_0 = arith.constant 0 : i32
    %c0_i32_1 = arith.constant 0 : i32
    return %c0_i32, %c0_i32_0 : i32, i32
  }
  func.func @transform_3(%arg0: i32) -> (i32, i32) {
    %c0_i32 = arith.constant 0 : i32
    %c0_i32_0 = arith.constant 0 : i32
    return %arg0, %c0_i32 : i32, i32
  }
}

</mosaic_0001>

<bundles_post_ra>
// kernel: aug_projector_forward.1
= control target key start
LH: loop header
LB: loop body
LE: loop exit
PB: predicated region body
PF: predicated region fallthrough
CT: control target
= control target key end

     0   :  { %8 = vsyncpa [#allocation3], 0  ;;  %s674_s12 = smov [#allocation2]   ;;  %s755_s0 = inlined_call_operand.vmem [shape: f32[8,128], index: 0, kind: input, shape index: {}]   ;;  %s756_s1 = inlined_call_operand.vmem [shape: f32[8,32], index: 1, kind: input, shape index: {}]   ;;  %s757_s2 = inlined_call_operand.hbm [shape: f32[424,128], index: 2, kind: input, shape index: {}]   ;;  %s758_s3 = inlined_call_operand.vmem [shape: f32[8,128], index: 3, kind: output, shape index: {}]  }
   0x1   :  { %s18_s13 = sshll.u32 %s674_s12, 4  ;;  %s650_s16 = scalar_lea.hbm %s757_s2, 6784  ;;  %s19_s13 = int_to_ptr.vmem [resolvable:$true] %s18_s13 }
   0x2   :  { %p651_p0 = scmp.ne.s32.totalorder %s757_s2, %s650_s16  ;;  %p654_p1 = scmp.lt.u32.totalorder %s650_s16, %s757_s2 }
   0x4   :  { %p656_p2 = pnand %p654_p1, %p651_p0 }
   0x6   :  { %659 = shalt.err (!%p656_p2)
}
   0x7   :  { %s660_s21 = scalar_lea.vmem %s19_s13, 6784  ;;  %p665_p4 = scmp.lt.s32.totalorder %s19_s13, %s19_s13 }
   0x8   :  { %p661_p3 = scmp.ne.s32.totalorder %s19_s13, %s660_s21  ;;  %p666_p5 = scmp.lt.s32.totalorder %s660_s21, %s660_s21 }
   0xa   :  { %p667_p6 = por %p666_p5, %p665_p4 }
   0xc   :  { %p668_p7 = pnand %p667_p6, %p661_p3 }
   0xe   :  { %671 = shalt.err (!%p668_p7)
}
   0xf   :  { %s675_s22 = smov 128   ;;  %s676_s23 = smov 8  }
  0x10   :  { %24 = dma.hbm_to_vmem [thread:$0]  %s757_s2, 6784, %s19_s13, [#allocation3], %s675_s22, %s675_s22, %s676_s23  }
  0x11   :  { %672 = dma.done.wait [#allocation3], 6784  }
  0x12   :  { %673 = vsyncadd [#allocation3], 4294960512  ;;  %v677_v0 = vmov 0.0|0.0   ;;  %vm678_vm0 = vmmov 0   ;;  %v679_v1 = vmov 0.0   ;;  %v30_v2 = vld [vmem:[#allocation2] sm:$0xff] }
  0x13   :  { %566 = vmatprep.subr.bf16.mxu0 %v677_v0  ;;  %458 = vmatprep.mubr.msk.f32.mxu0 %vm678_vm0, %v679_v1  ;;  %v31_v3 = vld [vmem:[#allocation2 + $0x8] sm:$0xff]  ;;  %v32_v4 = vld [vmem:[#allocation2 + $0x10] sm:$0xff]  ;;  %v33_v6 = vld [vmem:[#allocation2 + $0x18] sm:$0xff]  ;;  %vm89_vm1 = vcmask 261120  }
  0x14   :  { %572 = vmatprep.subr.bf16.mxu1 %v677_v0  ;;  %493 = vmatprep.mubr.msk.f32.mxu1 %vm678_vm0, %v679_v1  ;;  %v567_v5 = vpack.c.bf16 %v31_v3, %v30_v2  ;;  %v50_v7 = vld [vmem:[#allocation2 + $0xa0] sm:$0xff]  ;;  %v51_v8 = vld [vmem:[#allocation2 + $0xa8] sm:$0xff]  ;;  %v570_v9 = vpack.c.bf16 %v33_v6, %v32_v4  ;;  %v52_v11 = vld [vmem:[#allocation2 + $0xb0] sm:$0xff] }
  0x15   :  { %v573_v10 = vpack.c.bf16 %v51_v8, %v50_v7  ;;  %v34_v12 = vld [vmem:[#allocation2 + $0x20] sm:$0xff]  ;;  %v35_v13 = vld [vmem:[#allocation2 + $0x28] sm:$0xff]  ;;  %v53_v14 = vld [vmem:[#allocation2 + $0xb8] sm:$0xff] }
  0x16   :  { %568 = vmatpush3.bf16.msra.mxu0 %v567_v5  ;;  %v576_v15 = vpack.c.bf16 %v53_v14, %v52_v11  ;;  %v54_v16 = vld [vmem:[#allocation2 + $0xc0] sm:$0xff]  ;;  %v55_v17 = vld [vmem:[#allocation2 + $0xc8] sm:$0xff]  ;;  %v597_v19 = vpack.c.bf16 %v35_v13, %v34_v12  ;;  %v36_v20 = vld [vmem:[#allocation2 + $0x30] sm:$0xff] }
  0x17   :  { %569 = vmatprep.subr.bf16.mxu0 %v677_v0  ;;  %574 = vmatpush3.bf16.msra.mxu1 %v573_v10  ;;  %v29_v18 = vld [vmem:[%s756_s1] sm:$0xff]  ;;  %v37_v21 = vld [vmem:[#allocation2 + $0x38] sm:$0xff]  ;;  %v579_v22 = vpack.c.bf16 %v55_v17, %v54_v16  ;;  %v56_v23 = vld [vmem:[#allocation2 + $0xd0] sm:$0xff] }
  0x18   :  { %575 = vmatprep.subr.bf16.mxu1 %v677_v0  ;;  %v57_v24 = vld [vmem:[#allocation2 + $0xd8] sm:$0xff]  ;;  %v600_v25 = vpack.c.bf16 %v37_v21, %v36_v20  ;;  %v38_v26 = vld [vmem:[#allocation2 + $0x40] sm:$0xff]  ;;  %v39_v27 = vld [vmem:[#allocation2 + $0x48] sm:$0xff] }
  0x19   :  { %v582_v28 = vpack.c.bf16 %v57_v24, %v56_v23  ;;  %v58_v29 = vld [vmem:[#allocation2 + $0xe0] sm:$0xff]  ;;  %v59_v30 = vld [vmem:[#allocation2 + $0xe8] sm:$0xff]  ;;  %v603_v31 = vpack.c.bf16 %v39_v27, %v38_v26  ;;  %v40_v32 = vld [vmem:[#allocation2 + $0x50] sm:$0xff] }
  0x1a   :  { %571 = vmatpush3.bf16.msra.mxu0 %v570_v9  ;;  %v41_v33 = vld [vmem:[#allocation2 + $0x58] sm:$0xff]  ;;  %v585_v34 = vpack.c.bf16 %v59_v30, %v58_v29  ;;  %v60_v35 = vld [vmem:[#allocation2 + $0xf0] sm:$0xff]  ;;  %v42_v38 = vld [vmem:[#allocation2 + $0x60] sm:$0xff] }
  0x1b   :  { %596 = vmatprep.subr.bf16.mxu0 %v677_v0  ;;  %577 = vmatpush3.bf16.msra.mxu1 %v576_v15  ;;  %v61_v36 = vld [vmem:[#allocation2 + $0xf8] sm:$0xff]  ;;  %v606_v37 = vpack.c.bf16 %v41_v33, %v40_v32  ;;  %v43_v39 = vld [vmem:[#allocation2 + $0x68] sm:$0xff]  ;;  %v62_v41 = vld [vmem:[#allocation2 + $0x100] sm:$0xff] }
  0x1c   :  { %578 = vmatprep.subr.bf16.mxu1 %v677_v0  ;;  %v588_v40 = vpack.c.bf16 %v61_v36, %v60_v35  ;;  %v63_v42 = vld [vmem:[#allocation2 + $0x108] sm:$0xff]  ;;  %v609_v43 = vpack.c.bf16 %v43_v39, %v42_v38  ;;  %v44_v44 = vld [vmem:[#allocation2 + $0x70] sm:$0xff]  ;;  %v45_v45 = vld [vmem:[#allocation2 + $0x78] sm:$0xff] }
  0x1d   :  { %459 = vmatmul.mubr.msk.f32.vlgmr.msra.gmra.mrb[0].mxu0 %vm89_vm1, %v29_v18  ;;  %v591_v46 = vpack.c.bf16 %v63_v42, %v62_v41  ;;  %v612_v47 = vpack.c.bf16 %v45_v45, %v44_v44  ;;  %v46_v48 = vld [vmem:[#allocation2 + $0x80] sm:$0xff]  ;;  %v47_v49 = vld [vmem:[#allocation2 + $0x88] sm:$0xff]  ;;  %v48_v51 = vld [vmem:[#allocation2 + $0x90] sm:$0xff] }
  0x1e   :  { %598 = vmatpush3.bf16.msra.mxu0 %v597_v19  ;;  %528 = vmatprep.mubr.msk.f32.mxu0 %vm678_vm0, %v679_v1  ;;  %v615_v50 = vpack.c.bf16 %v47_v49, %v46_v48  ;;  %v49_v52 = vld [vmem:[#allocation2 + $0x98] sm:$0xff]  ;;  %v64_v54 = vld [vmem:[#allocation2 + $0x110] sm:$0xff]  ;;  %v28_v57 = vld [vmem:[%s755_s0] sm:$0xff] }
  0x1f   :  { %599 = vmatprep.subr.bf16.mxu0 %v677_v0  ;;  %580 = vmatpush3.bf16.msra.mxu1 %v579_v22  ;;  %v618_v53 = vpack.c.bf16 %v49_v52, %v48_v51  ;;  %v65_v55 = vld [vmem:[#allocation2 + $0x118] sm:$0xff]  ;;  %v390_v58 = vld [vmem:[#allocation2 + $0x1a0] ss:$0 sm:$0xff]  ;;  %v67_v60 = vld [vmem:[#allocation2 + $0x128] sm:$0xff] }
  0x20   :  { %581 = vmatprep.subr.bf16.mxu1 %v677_v0  ;;  %v594_v56 = vpack.c.bf16 %v65_v55, %v64_v54  ;;  %v66_v59 = vld [vmem:[#allocation2 + $0x120] sm:$0xff]  ;;  %v68_v4 = vld [vmem:[#allocation2 + $0x130] sm:$0xff]  ;;  %v69_v5 = vld [vmem:[#allocation2 + $0x138] sm:$0xff] }
  0x21   :  { %v621_v2 = vpack.c.bf16 %v67_v60, %v66_v59  ;;  %v624_v6 = vpack.c.bf16 %v69_v5, %v68_v4  ;;  %v70_v7 = vld [vmem:[#allocation2 + $0x140] sm:$0xff]  ;;  %v71_v8 = vld [vmem:[#allocation2 + $0x148] sm:$0xff]  ;;  %v72_v10 = vld [vmem:[#allocation2 + $0x150] sm:$0xff] }
  0x22   :  { %601 = vmatpush3.bf16.msra.mxu0 %v600_v25  ;;  %v627_v9 = vpack.c.bf16 %v71_v8, %v70_v7  ;;  %v73_v11 = vld [vmem:[#allocation2 + $0x158] sm:$0xff]  ;;  %v74_v13 = vld [vmem:[#allocation2 + $0x160] sm:$0xff]  ;;  %v75_v14 = vld [vmem:[#allocation2 + $0x168] sm:$0xff] }
  0x23   :  { %602 = vmatprep.subr.bf16.mxu0 %v677_v0  ;;  %583 = vmatpush3.bf16.msra.mxu1 %v582_v28  ;;  %v630_v12 = vpack.c.bf16 %v73_v11, %v72_v10  ;;  %v633_v15 = vpack.c.bf16 %v75_v14, %v74_v13  ;;  %v77_v16 = vld [vmem:[#allocation2 + $0x178] sm:$0xff]  ;;  %v78_v18 = vld [vmem:[#allocation2 + $0x180] sm:$0xff]  ;;  %v79_v19 = vld [vmem:[#allocation2 + $0x188] sm:$0xff] }
  0x24   :  { %584 = vmatprep.subr.bf16.mxu1 %v677_v0  ;;  %v639_v20 = vpack.c.bf16 %v79_v19, %v78_v18  ;;  %v80_v23 = vld [vmem:[#allocation2 + $0x190] sm:$0xff]  ;;  %v81_v24 = vld [vmem:[#allocation2 + $0x198] sm:$0xff]  ;;  %v392_v26 = vld [vmem:[#allocation2 + $0x1a1] ss:$0 sm:$0xff] }
  0x25   :  { %v642_v25 = vpack.c.bf16 %v81_v24, %v80_v23  ;;  %v393_v32 = vld [vmem:[#allocation2 + $0x1a2] ss:$0 sm:$0xff] }
  0x26   :  { %604 = vmatpush3.bf16.msra.mxu0 %v603_v31 }
  0x27   :  { %605 = vmatprep.subr.bf16.mxu0 %v677_v0  ;;  %586 = vmatpush3.bf16.msra.mxu1 %v585_v34 }
  0x28   :  { %587 = vmatprep.subr.bf16.mxu1 %v677_v0 }
  0x2a   :  { %607 = vmatpush3.bf16.msra.mxu0 %v606_v37 }
  0x2b   :  { %608 = vmatprep.subr.bf16.mxu0 %v677_v0  ;;  %589 = vmatpush3.bf16.msra.mxu1 %v588_v40 }
  0x2c   :  { %590 = vmatprep.subr.bf16.mxu1 %v677_v0 }
  0x2e   :  { %610 = vmatpush3.bf16.msra.mxu0 %v609_v43 }
  0x2f   :  { %611 = vmatprep.subr.bf16.mxu0 %v677_v0  ;;  %592 = vmatpush3.bf16.msra.mxu1 %v591_v46 }
  0x30   :  { %593 = vmatprep.subr.bf16.mxu1 %v677_v0 }
  0x32   :  { %613 = vmatpush3.bf16.msra.mxu0 %v612_v47 }
  0x33   :  { %614 = vmatprep.subr.bf16.mxu0 %v677_v0  ;;  %595 = vmatpush3.bf16.msra.mxu1 %v594_v56 }
  0x34   :  { %620 = vmatprep.subr.bf16.mxu1 %v677_v0 }
  0x36   :  { %616 = vmatpush3.bf16.msra.mxu0 %v615_v50 }
  0x37   :  { %617 = vmatprep.subr.bf16.mxu0 %v677_v0 }
  0x3a   :  { %619 = vmatpush3.bf16.msra.mxu0 %v618_v53 }
  0x3d   :  { %529 = vmatmul.mubr.f32.vlgmr.msra.gmra.mrb[2].mxu0 %v28_v57 }
  0xf0   :  { %v159_v61 = vpop.f32.mrb[0].mxu0 }
  0xf1   :  { %v160_v62 = vadd.f32 %v390_v58, %v159_v61  ;;  %v460_v63 = vpop.f32.mrb[1].mxu0 }
  0xf3   :  { %v163_v3 = vmax.f32 %v160_v62, 0.0 }
  0xf5   :  { %494 = vmatmul.mubr.f32.vlgmr.msra.gmra.mrb[0].mxu1 %v163_v3 }
  0xf6   :  { %622 = vmatpush3.bf16.msra.mxu1 %v621_v2  ;;  %563 = vmatprep.mubr.msk.f32.mxu1 %vm678_vm0, %v679_v1  ;;  %v76_v1 = vld [vmem:[#allocation2 + $0x170] sm:$0xff] }
  0xf7   :  { %623 = vmatprep.subr.bf16.mxu1 %v677_v0  ;;  %v636_v17 = vpack.c.bf16 %v77_v16, %v76_v1 }
  0xfa   :  { %625 = vmatpush3.bf16.msra.mxu1 %v624_v6 }
  0xfb   :  { %626 = vmatprep.subr.bf16.mxu1 %v677_v0 }
  0xfe   :  { %628 = vmatpush3.bf16.msra.mxu1 %v627_v9 }
  0xff   :  { %629 = vmatprep.subr.bf16.mxu1 %v677_v0 }
 0x102   :  { %631 = vmatpush3.bf16.msra.mxu1 %v630_v12 }
 0x103   :  { %632 = vmatprep.subr.bf16.mxu1 %v677_v0 }
 0x106   :  { %634 = vmatpush3.bf16.msra.mxu1 %v633_v15 }
 0x107   :  { %635 = vmatprep.subr.bf16.mxu1 %v677_v0 }
 0x10a   :  { %637 = vmatpush3.bf16.msra.mxu1 %v636_v17 }
 0x10b   :  { %638 = vmatprep.subr.bf16.mxu1 %v677_v0 }
 0x10e   :  { %640 = vmatpush3.bf16.msra.mxu1 %v639_v20 }
 0x10f   :  { %641 = vmatprep.subr.bf16.mxu1 %v677_v0 }
 0x110   :  { %v300_v21 = vpop.f32.mrb[2].mxu0 }
 0x111   :  { %v530_v22 = vpop.f32.mrb[3].mxu0 }
 0x112   :  { %643 = vmatpush3.bf16.msra.mxu1 %v642_v25 }
 0x1c8   :  { %v230_v27 = vpop.f32.mrb[0].mxu1 }
 0x1c9   :  { %v301_v28 = vadd.f32 %v300_v21, %v230_v27  ;;  %v495_v29 = vpop.f32.mrb[1].mxu1 }
 0x1cb   :  { %v308_v30 = vadd.f32 %v392_v26, %v301_v28 }
 0x1cd   :  { %v309_v31 = vmax.f32 %v308_v30, 0.0 }
 0x1cf   :  { %564 = vmatmul.mubr.f32.vlgmr.msra.gmra.mrb[2].mxu1 %v309_v31 }
 0x2a2   :  { %v380_v33 = vpop.f32.mrb[2].mxu1 }
 0x2a3   :  { %v381_v34 = vadd.f32 %v393_v32, %v380_v33  ;;  %v565_v35 = vpop.f32.mrb[3].mxu1 }
 0x2a5   :  { %384 = vst [vmem:[%s758_s3] sm:$0xff] %v381_v34 }
 0x2a6   :  { %389 = vsyncpa [#allocation3], 1 }

</bundles_post_ra>
